<compile_context>
chip_gen: v7x
topology: tpu7x:2x2x1
jax: 0.10.0
libtpu: 0.0.40
codegen_flags: <defaults>
</compile_context>

<pallas_src>
import functools

import jax
import jax.numpy as jnp
from jax import lax
from jax.experimental import pallas as pl
from jax.experimental.pallas import tpu as pltpu

LEAKY_SLOPE = 0.01  # PyTorch nn.LeakyReLU default negative_slope


def _mlp_kernel(x_ref, w1_ref, b1_ref, w2_ref, b2_ref, ot_ref):
    # x_ref : (bn, Cin)   row-major block (contiguous HBM DMA)
    # w1_ref: (H, Cin)    b1_ref: (H, 1)
    # w2_ref: (Cout, H)   b2_ref: (Cout, 1)
    # ot_ref: (Cout, bn)  feature-major, lane-dense store
    x_mm = x_ref[...].astype(w1_ref.dtype)  # in-kernel bf16 cast: no extra HBM pass

    # linear1: h^T = W1 @ x^T  (contract the last dim of both operands; Mosaic
    # handles the transpose on the XLU).  f32 accumulation on the MXU.
    h = lax.dot_general(
        w1_ref[...], x_mm,
        dimension_numbers=(((1,), (1,)), ((), ())),
        preferred_element_type=jnp.float32)          # (H, bn) f32
    h = h + b1_ref[...]                              # (H,1) broadcast along lanes
    h = jnp.maximum(h, LEAKY_SLOPE * h)              # LeakyReLU, 2 VPU ops/elem

    # linear2: y^T = W2 @ h^T
    y = jnp.dot(w2_ref[...], h.astype(w2_ref.dtype),
                preferred_element_type=jnp.float32)  # (Cout, bn) f32
    y = y + b2_ref[...]
    ot_ref[...] = y.astype(ot_ref.dtype)


def _round_up(a, m):
    return ((a + m - 1) // m) * m


def _pick_block_n(n):
    # Large tiles to amortize the ~0.35us per-grid-step overhead, but keep
    # >=8 grid steps when N allows so v7x's two TensorCores each get >=4
    # pipelined steps.  Cap at 16384 rows/step (VMEM-checked below).
    n128 = _round_up(n, 128)
    per_step = _round_up(pl.cdiv(n128, 8), 128)
    bn = max(128, min(16384, per_step))
    if bn >= n:
        bn = n  # single full-extent block: always a legal block shape
    return bn


def _tile_bytes(sub, lane, itemsize):
    # VMEM footprint of a (sub, lane) array: sublane packing 32/itemsize,
    # lanes pad to 128.
    sub_tile = max(1, 32 // itemsize)
    return _round_up(sub, sub_tile) * _round_up(lane, 128) * itemsize


def _vmem_limit_bytes(bn, cin, hidden, cout, x_isz, mm_isz, out_isz):
    x_buf = _tile_bytes(bn, cin, x_isz)          # streamed input (lane-pads cin->128)
    o_buf = _tile_bytes(cout, bn, out_isz)       # streamed output
    h_tmp = _tile_bytes(hidden, bn, 4)           # f32 intermediate (compiler temp)
    x_cast = _tile_bytes(bn, cin, mm_isz) if mm_isz != x_isz else 0
    resident = 2 * (_tile_bytes(hidden, cin, mm_isz)
                    + _tile_bytes(cout, hidden, mm_isz)
                    + _tile_bytes(hidden, 1, 4)
                    + _tile_bytes(cout, 1, 4))
    need = 2 * (x_buf + o_buf) + h_tmp + x_cast + resident   # 2x = double buffering
    # ~2x headroom for compiler scratch; floor 8 MiB, cap 48 MiB (<= v7x 64 MiB).
    return int(min(max(2 * need, 8 << 20), 48 << 20))


@functools.partial(jax.jit,
                   static_argnames=("block_n", "use_bf16", "feature_major_output"))
def map_e2nxn_forward(x, w1, b1, w2, b2, block_n=None, use_bf16=True,
                      feature_major_output=False):
    """MapE2NxN forward: Linear(Cin->H) -> LeakyReLU -> Linear(H->Cout).

    x : [N, Cin]; w1 : [H, Cin]; b1 : [H]; w2 : [Cout, H]; b2 : [Cout]
    (PyTorch nn.Linear weight layout.)  Returns [N, Cout] (or the lane-dense
    [Cout, N] when feature_major_output=True).

    use_bf16=True (default) uses bf16 MXU operands with f32 accumulation and
    f32 bias/activation; set False for exact f32 results.
    """
    n, cin = x.shape
    hidden = w1.shape[0]
    cout = w2.shape[0]

    if block_n is None:
        block_n = _pick_block_n(n)
    grid = (pl.cdiv(n, block_n),)   # ragged last block is clipped by Pallas

    mm_dtype = jnp.bfloat16 if use_bf16 else jnp.float32
    w1_k = w1.astype(mm_dtype)
    w2_k = w2.astype(mm_dtype)
    b1_2d = b1.reshape(hidden, 1).astype(jnp.float32)
    b2_2d = b2.reshape(cout, 1).astype(jnp.float32)

    out_dtype = x.dtype
    x_isz = jnp.dtype(x.dtype).itemsize
    mm_isz = jnp.dtype(mm_dtype).itemsize
    out_isz = jnp.dtype(out_dtype).itemsize

    cost = pl.CostEstimate(
        flops=2 * n * (cin * hidden + hidden * cout) + n * (hidden + cout),
        transcendentals=0,
        bytes_accessed=(n * cin * x_isz + n * cout * out_isz
                        + w1_k.size * mm_isz + w2_k.size * mm_isz
                        + (hidden + cout) * 4),
    )

    yt = pl.pallas_call(
        _mlp_kernel,
        out_shape=jax.ShapeDtypeStruct((cout, n), out_dtype),
        grid_spec=pltpu.PrefetchScalarGridSpec(
            num_scalar_prefetch=0,
            grid=grid,
            in_specs=[
                pl.BlockSpec((block_n, cin), lambda i: (i, 0)),   # x rows (contiguous DMA)
                pl.BlockSpec((hidden, cin), lambda i: (0, 0)),    # W1 (resident)
                pl.BlockSpec((hidden, 1), lambda i: (0, 0)),      # b1
                pl.BlockSpec((cout, hidden), lambda i: (0, 0)),   # W2 (resident)
                pl.BlockSpec((cout, 1), lambda i: (0, 0)),        # b2
            ],
            out_specs=pl.BlockSpec((cout, block_n), lambda i: (0, i)),  # lane-dense
        ),
        compiler_params=pltpu.CompilerParams(
            dimension_semantics=("parallel",),
            vmem_limit_bytes=_vmem_limit_bytes(block_n, cin, hidden, cout,
                                               x_isz, mm_isz, out_isz),
        ),
        cost_estimate=cost,
    )(x, w1_k, b1_2d, w2_k, b2_2d)

    if feature_major_output:
        return yt            # (Cout, N) — skip the extra transpose pass entirely
    return yt.T              # [N, Cout] to match the PyTorch module


def _torch_linear_init(key, out_features, in_features):
    """Deterministic init matching nn.Linear's uniform(-1/sqrt(fan_in)) bounds."""
    kw, kb = jax.random.split(key)
    bound = 1.0 / jnp.sqrt(jnp.float32(in_features))
    w = jax.random.uniform(kw, (out_features, in_features), jnp.float32,
                           minval=-bound, maxval=bound)
    b = jax.random.uniform(kb, (out_features,), jnp.float32,
                           minval=-bound, maxval=bound)
    return w, b


if __name__ == "__main__":
    # Small shapes consistent with MapE2NxN: x is [num_edges, in_channels].
    # N deliberately NOT a multiple of 128 to exercise the ragged-edge block.
    N, IN_CH, HIDDEN, OUT_CH = 300, 16, 32, 8

    key = jax.random.PRNGKey(0)
    k_x, k_l1, k_l2 = jax.random.split(key, 3)

    x = jax.random.normal(k_x, (N, IN_CH), jnp.float32)
    w1, b1 = _torch_linear_init(k_l1, HIDDEN, IN_CH)   # linear1: (H, Cin), (H,)
    w2, b2 = _torch_linear_init(k_l2, OUT_CH, HIDDEN)  # linear2: (Cout, H), (Cout,)

    # Pure-JAX reference (same math as the PyTorch forward).
    h_ref = x @ w1.T + b1
    h_ref = jnp.where(h_ref > 0, h_ref, LEAKY_SLOPE * h_ref)
    y_ref = h_ref @ w2.T + b2

    # Exact f32 path: tight tolerance.
    out_f32 = jax.block_until_ready(
        map_e2nxn_forward(x, w1, b1, w2, b2, use_bf16=False))
    assert out_f32.shape == (N, OUT_CH)
    assert jnp.allclose(out_f32, y_ref, atol=1e-5, rtol=1e-5), "f32 mismatch vs reference"

    # Default fast path (bf16 MXU operands, f32 accumulation): looser tolerance.
    out_bf16 = jax.block_until_ready(map_e2nxn_forward(x, w1, b1, w2, b2))
    assert out_bf16.shape == (N, OUT_CH)
    assert jnp.allclose(out_bf16, y_ref, atol=5e-2, rtol=5e-2), "bf16 mismatch vs reference"

    print("KERNEL_OK")
</pallas_src>

<mosaic_0001>
module attributes {stable_mosaic.version = 11 : i64} {
  func.func @_mlp_kernel(%arg0: i32, %arg1: memref<128x16xf32, #tpu.memory_space<vmem>>, %arg2: memref<32x16xf32, #tpu.memory_space<vmem>>, %arg3: memref<32x1xf32, #tpu.memory_space<vmem>>, %arg4: memref<8x32xf32, #tpu.memory_space<vmem>>, %arg5: memref<8x1xf32, #tpu.memory_space<vmem>>, %arg6: memref<8x128xf32, #tpu.memory_space<vmem>>) attributes {dimension_semantics = [#tpu.dimension_semantics<parallel>], iteration_bounds = array<i64: 3>, scalar_prefetch = 0 : i64, scratch_operands = 0 : i64, tpu.core_type = #tpu.core_type<tc>, window_params = [{transform_indices = @transform_0, window_bounds = array<i64: 128, 16>}, {pipeline_mode = #tpu.pipeline_mode<synchronous>, transform_indices = @transform_1, window_bounds = array<i64: 32, 16>}, {pipeline_mode = #tpu.pipeline_mode<synchronous>, transform_indices = @transform_2, window_bounds = array<i64: 32, 1>}, {pipeline_mode = #tpu.pipeline_mode<synchronous>, transform_indices = @transform_3, window_bounds = array<i64: 8, 32>}, {pipeline_mode = #tpu.pipeline_mode<synchronous>, transform_indices = @transform_4, window_bounds = array<i64: 8, 1>}, {transform_indices = @transform_5, window_bounds = array<i64: 8, 128>}]} {
    %c0 = arith.constant 0 : index
    %c0_0 = arith.constant 0 : index
    %0 = vector.load %arg1[%c0, %c0_0] : memref<128x16xf32, #tpu.memory_space<vmem>>, vector<128x16xf32>
    %c0_1 = arith.constant 0 : index
    %c0_2 = arith.constant 0 : index
    %1 = vector.load %arg2[%c0_1, %c0_2] : memref<32x16xf32, #tpu.memory_space<vmem>>, vector<32x16xf32>
    %cst = arith.constant dense<0.000000e+00> : vector<32x128xf32>
    %2 = tpu.matmul %1, %0, %cst {dimension_numbers = #tpu.dot_dimension_numbers<[1], [1], [0], [0], [0, 0, 1, 0], [], []>} : vector<32x16xf32>, vector<128x16xf32>, vector<32x128xf32> -> vector<32x128xf32>
    %c0_3 = arith.constant 0 : index
    %c0_4 = arith.constant 0 : index
    %3 = vector.load %arg3[%c0_3, %c0_4] : memref<32x1xf32, #tpu.memory_space<vmem>>, vector<32x1xf32>
    %4 = vector.broadcast %3 : vector<32x1xf32> to vector<32x128xf32>
    %5 = arith.addf %2, %4 : vector<32x128xf32>
    %cst_5 = arith.constant 0.00999999977 : f32
    %6 = vector.broadcast %cst_5 : f32 to vector<32x128xf32>
    %7 = arith.mulf %6, %5 : vector<32x128xf32>
    %8 = arith.maximumf %5, %7 : vector<32x128xf32>
    %c0_6 = arith.constant 0 : index
    %c0_7 = arith.constant 0 : index
    %9 = vector.load %arg4[%c0_6, %c0_7] : memref<8x32xf32, #tpu.memory_space<vmem>>, vector<8x32xf32>
    %cst_8 = arith.constant dense<0.000000e+00> : vector<8x128xf32>
    %10 = tpu.matmul %9, %8, %cst_8 {dimension_numbers = #tpu.dot_dimension_numbers<[1], [0], [0], [1], [0, 0, 1, 1], [], []>} : vector<8x32xf32>, vector<32x128xf32>, vector<8x128xf32> -> vector<8x128xf32>
    %c0_9 = arith.constant 0 : index
    %c0_10 = arith.constant 0 : index
    %11 = vector.load %arg5[%c0_9, %c0_10] : memref<8x1xf32, #tpu.memory_space<vmem>>, vector<8x1xf32>
    %12 = vector.broadcast %11 : vector<8x1xf32> to vector<8x128xf32>
    %13 = arith.addf %10, %12 : vector<8x128xf32>
    %c0_11 = arith.constant 0 : index
    %c0_12 = arith.constant 0 : index
    %14 = vector.load %arg6[%c0_11, %c0_12] : memref<8x128xf32, #tpu.memory_space<vmem>>, vector<8x128xf32>
    tpu.vector_store %arg6[%c0_11, %c0_12], %13 {strides = array<i32>} : memref<8x128xf32, #tpu.memory_space<vmem>>, vector<8x128xf32>,
    return
  }
  func.func @transform_0(%arg0: i32) -> (i32, i32) {
    %c0_i32 = arith.constant 0 : i32
    %c0_i32_0 = arith.constant 0 : i32
    return %arg0, %c0_i32 : i32, i32
  }
  func.func @transform_1(%arg0: i32) -> (i32, i32) {
    %c0_i32 = arith.constant 0 : i32
    %c0_i32_0 = arith.constant 0 : i32
    %c0_i32_1 = arith.constant 0 : i32
    return %c0_i32, %c0_i32_0 : i32, i32
  }
  func.func @transform_2(%arg0: i32) -> (i32, i32) {
    %c0_i32 = arith.constant 0 : i32
    %c0_i32_0 = arith.constant 0 : i32
    %c0_i32_1 = arith.constant 0 : i32
    return %c0_i32, %c0_i32_0 : i32, i32
  }
  func.func @transform_3(%arg0: i32) -> (i32, i32) {
    %c0_i32 = arith.constant 0 : i32
    %c0_i32_0 = arith.constant 0 : i32
    %c0_i32_1 = arith.constant 0 : i32
    return %c0_i32, %c0_i32_0 : i32, i32
  }
  func.func @transform_4(%arg0: i32) -> (i32, i32) {
    %c0_i32 = arith.constant 0 : i32
    %c0_i32_0 = arith.constant 0 : i32
    %c0_i32_1 = arith.constant 0 : i32
    return %c0_i32, %c0_i32_0 : i32, i32
  }
  func.func @transform_5(%arg0: i32) -> (i32, i32) {
    %c0_i32 = arith.constant 0 : i32
    %c0_i32_0 = arith.constant 0 : i32
    return %c0_i32, %arg0 : i32, i32
  }
}

</mosaic_0001>

<bundles_post_ra>
// kernel: map_e2nxn_forward.1
= control target key start
LH: loop header
LB: loop body
LE: loop exit
PB: predicated region body
PF: predicated region fallthrough
CT: control target
= control target key end

     0   :  { %10 = vsyncpa [#allocation3], 0  ;;  %s1091_s0 = inlined_call_operand.vmem [shape: f32[300,16], index: 0, kind: input, shape index: {}]   ;;  %s1092_s1 = inlined_call_operand.vmem [shape: f32[32,16], index: 1, kind: input, shape index: {}]   ;;  %s1093_s2 = inlined_call_operand.vmem [shape: f32[32,1], index: 2, kind: input, shape index: {}]   ;;  %s1094_s3 = inlined_call_operand.vmem [shape: f32[8,32], index: 3, kind: input, shape index: {}]   ;;  %s1095_s4 = inlined_call_operand.vmem [shape: f32[8,1], index: 4, kind: input, shape index: {}]   ;;  %s1096_s5 = inlined_call_operand.hbm [shape: f32[8,300], index: 5, kind: output, shape index: {}]  }
   0x1   :  { %12 = vsyncpa [#allocation3 + $0x1], 0  ;;  %s902_s18 = smov 0   ;;  %s904_s19 = smov 0  }
   0x2   :  { %s906_s20 = smov 0   ;;  %s908_s21 = smov 0  }
   0x3 LB: > { %s923_s22 = sadd.s32 4294967295, %s865_s21   ;;  %s598_s23 = sadd.s32 4294967294, %s865_s21   ;;  %s865_s21 = sphi %s908_s21, %s1104_s21   ;;  %s861_s20 = sphi %s906_s20, %s1103_s20   ;;  %s857_s19 = sphi %s904_s19, %s1102_s19   ;;  %s853_s18 = sphi %s902_s18, %s1101_s18  }
   0x4   : > { %s927_s24 = sadd.s32 1, %s865_s21   ;;  %s135_s25 = sadd.s32 1, %s861_s20 }
   0x5   : > { %s132_s26 = ssub.s32 %s865_s21, %s927_s24  ;;  %p145_p0 = scmp.ne.s32.totalorder %s861_s20, %s857_s19 }
   0x6   : > { %p133_p1 = scmp.eq.s32.totalorder %s132_s26, 0  ;;  %p146_p2 = scmp.eq.s32.totalorder %s923_s22, 2 }
   0x7   : > { %p151_p3 = scmp.ne.s32.totalorder %s857_s19, %s853_s18  ;;  %p152_p4 = scmp.eq.s32.totalorder %s598_s23, 2 }
   0x8   : > { %s938_s27 = scalar_select %p133_p1, %s861_s20, %s135_s25  }
   0x9   : > { %p940_p5 = por %p146_p2, %p145_p0  ;;  %p944_p6 = por %p152_p4, %p151_p3 }
   0xa   : > { %p601_p7 = scmp.ge.s32.totalorder %s865_s21, 1  ;;  %p199_p8 = scmp.lt.s32.totalorder %s865_s21, 4 }
   0xc   : > { %p200_p9 = pnand %p601_p7, %p199_p8 }
   0xd   : > { %s603_s30 = sshll.u32 (!%p200_p9), %s923_s22, 4  ;;  %vm289_vm0 = vcmask (!%p200_p9), 130048   ;;  %v261_v0 = vld [vmem:[%s1092_s1] sm:$0xff] (!%p200_p9)  ;;  %v867_v1 = vmov (!%p200_p9), 0   ;;  %v267_v3 = vld [vmem:[%s1093_s2 + $0x10] sm:$0xff] (!%p200_p9)  ;;  %v266_v4 = vld [vmem:[%s1093_s2 + $0x8] sm:$0xff] (!%p200_p9) }
   0xe   : > { %203 = sbr.rel (%p200_p9) target bundleno = 547 (0x223), region = 40  ;;  %p236_p10 = scmp.lt.s32.totalorder (!%p200_p9), %s603_s30, 37  ;;  %687 = vmatprep.mubr.msk.f32.mxu0 (!%p200_p9), %vm289_vm0, %v261_v0  ;;  %801 = vset.pattern.permute.xlu0 (!%p200_p9), %v867_v1  ;;  %v265_v2 = vld [vmem:[%s1093_s2] sm:$0xff] (!%p200_p9)  ;;  %v268_v5 = vld [vmem:[%s1093_s2 + $0x18] sm:$0xff] (!%p200_p9)  ;;  %vm974_vm1 = vmpackc.low (!%p200_p9), %vm289_vm0, %vm289_vm0  ;;  %v868_v35 = vmov (!%p200_p9), 0.0|0.0   ;;  %vm869_vm2 = vmmov (!%p200_p9), 0  }
   0xf   : > { %271 = vperm.xlu0 (!%p200_p9), %801, %v265_v2   ;;  %802 = vset.pattern.permute.xlu1 (!%p200_p9), %v867_v1  ;;  %v444_v7 = vld [vmem:[%s1095_s4] sm:$0xff] (!%p200_p9)  ;;  %v262_v32 = vld [vmem:[%s1092_s1 + $0x8] sm:$0xff] (!%p200_p9)  ;;  %v263_v33 = vld [vmem:[%s1092_s1 + $0x10] sm:$0xff] (!%p200_p9)  ;;  %v870_v36 = vmov (!%p200_p9), 0.0   ;;  %vm450_vm3 = vcmask (!%p200_p9), 261120   ;;  %s228_s14 = sand.u32 (!%p200_p9), 1, %s857_s19  }
  0x10   : > { %281 = vperm.xlu1 (!%p200_p9), %802, %v267_v3   ;;  %v264_v34 = vld [vmem:[%s1092_s1 + $0x18] sm:$0xff] (!%p200_p9)  ;;  %752 = vmatprep.subr.bf16.mxu1 (!%p200_p9), %v868_v35  ;;  %v443_v59 = vld [vmem:[%s1094_s3] sm:$0xff] (!%p200_p9)  ;;  %s602_s15 = sshll.u32 (!%p200_p9), %s228_s14, 3  ;;  %s526_s6 = scalar_lea.sflag (!%p200_p9), [#allocation3], %s228_s14 }
  0x11   : > { %701 = vmatprep.mubr.msk.f32.mxu1 (!%p200_p9), %vm869_vm2, %v870_v36  ;;  %s230_s17 = scalar_lea.vmem (!%p200_p9), [#allocation2], %s602_s15 }
  0x12   : > { %s539_s23 = sshll.u32 (!%p200_p9), %s230_s17, 4  ;;  %s1051_s23 = int_to_ptr.vmem [resolvable:$true] %s539_s23 }
  0x13   : > { %276 = vperm.xlu0 (!%p200_p9), %801, %v266_v4   ;;  %s803_s7 = scalar_lea.vmem (!%p200_p9), %s1051_s23, 128 }
  0x14   : > { %286 = vperm.xlu1 (!%p200_p9), %802, %v268_v5   ;;  %p804_p11 = scmp.ne.s32.totalorder (!%p200_p9), %s1051_s23, %s803_s7 }
  0x15   : > { %s1106_s30 = smov (!%p236_p10, %s603_s30), 37 }
  0x16   : > { %s604_s16 = sshll.u32 %s1106_s30, 3  ;;  %p805_p12 = pnand %p804_p11, %p940_p5 }
  0x17   : > { %s970_s25 = scalar_lea.vmem %s1091_s0, %s604_s16  ;;  %447 = vperm.xlu0 %801, %v444_v7   ;;  %s627_s16 = sshll.u32 %s923_s22, 7 }
  0x18   : > { %v245_v8 = vld [vmem:[%s970_s25] sm:$0xff]  ;;  %v246_v9 = vld [vmem:[%s970_s25 + $0x8] sm:$0xff]  ;;  %v247_v10 = vld [vmem:[%s970_s25 + $0x10] sm:$0xff]  ;;  %s1049_s30 = scalar_lea.hbm %s1096_s5, %s627_s16  ;;  %p806_p13 = pneg %p805_p12 }
  0x19   : > { %v704_v11 = vpack.c.bf16 %v246_v9, %v245_v8  ;;  %v248_v12 = vld [vmem:[%s970_s25 + $0x18] sm:$0xff]  ;;  %v249_v14 = vld [vmem:[%s970_s25 + $0x20] sm:$0xff]  ;;  %v250_v15 = vld [vmem:[%s970_s25 + $0x28] sm:$0xff]  ;;  %s871_s22 = smov [#allocation2]  }
  0x1a   : > { %v710_v13 = vpack.c.bf16 %v248_v12, %v247_v10  ;;  %v716_v16 = vpack.c.bf16 %v250_v15, %v249_v14  ;;  %v251_v17 = vld [vmem:[%s970_s25 + $0x30] sm:$0xff]  ;;  %v252_v18 = vld [vmem:[%s970_s25 + $0x38] sm:$0xff]  ;;  %v253_v20 = vld [vmem:[%s970_s25 + $0x40] sm:$0xff]  ;;  %s807_s8 = sshll.u32 %s871_s22, 4  ;;  %s808_s8 = int_to_ptr.vmem [resolvable:$false] %s807_s8 }
  0x1b   : > { %706 = vmatprep.subr.msk.bf16.mxu0 %vm974_vm1, %v704_v11  ;;  %v722_v19 = vpack.c.bf16 %v252_v18, %v251_v17  ;;  %v254_v21 = vld [vmem:[%s970_s25 + $0x48] sm:$0xff]  ;;  %v255_v23 = vld [vmem:[%s970_s25 + $0x50] sm:$0xff]  ;;  %v256_v24 = vld [vmem:[%s970_s25 + $0x58] sm:$0xff]  ;;  %s809_s9 = scalar_lea.vmem %s808_s8, 256  ;;  %p810_p0 = scmp.lt.s32.totalorder %s1051_s23, %s808_s8 }
  0x1c   : > { %709 = vmatpush3.bf16.xpose.msk.msra.mxu0 %vm974_vm1, %v704_v11  ;;  %v728_v22 = vpack.c.bf16 %v254_v21, %v253_v20  ;;  %v734_v25 = vpack.c.bf16 %v256_v24, %v255_v23  ;;  %v257_v26 = vld [vmem:[%s970_s25 + $0x60] sm:$0xff]  ;;  %v258_v27 = vld [vmem:[%s970_s25 + $0x68] sm:$0xff]  ;;  %v259_v29 = vld [vmem:[%s970_s25 + $0x70] sm:$0xff]  ;;  %p811_p1 = scmp.lt.s32.totalorder %s809_s9, %s803_s7 }
  0x1d   : > { %712 = vmatprep.subr.msk.bf16.mxu0 %vm974_vm1, %v710_v13  ;;  %v740_v28 = vpack.c.bf16 %v258_v27, %v257_v26  ;;  %v260_v30 = vld [vmem:[%s970_s25 + $0x78] sm:$0xff] }
  0x1e   : > { %v746_v31 = vpack.c.bf16 %v260_v30, %v259_v29  ;;  %p812_p2 = por %p811_p1, %p810_p0 }
  0x20   : > { %p813_p3 = pnand %p812_p2, %p806_p13 }
  0x24   : > { %715 = vmatpush3.bf16.xpose.msk.msra.mxu0 %vm974_vm1, %v710_v13 }
  0x25   : > { %718 = vmatprep.subr.msk.bf16.mxu0 %vm974_vm1, %v716_v16 }
  0x2c   : > { %721 = vmatpush3.bf16.xpose.msk.msra.mxu0 %vm974_vm1, %v716_v16 }
  0x2d   : > { %724 = vmatprep.subr.msk.bf16.mxu0 %vm974_vm1, %v722_v19 }
  0x34   : > { %727 = vmatpush3.bf16.xpose.msk.msra.mxu0 %vm974_vm1, %v722_v19 }
  0x35   : > { %730 = vmatprep.subr.msk.bf16.mxu0 %vm974_vm1, %v728_v22 }
  0x3c   : > { %733 = vmatpush3.bf16.xpose.msk.msra.mxu0 %vm974_vm1, %v728_v22 }
  0x3d   : > { %736 = vmatprep.subr.msk.bf16.mxu0 %vm974_vm1, %v734_v25 }
  0x44   : > { %739 = vmatpush3.bf16.xpose.msk.msra.mxu0 %vm974_vm1, %v734_v25 }
  0x45   : > { %742 = vmatprep.subr.msk.bf16.mxu0 %vm974_vm1, %v740_v28 }
  0x4c   : > { %745 = vmatpush3.bf16.xpose.msk.msra.mxu0 %vm974_vm1, %v740_v28 }
  0x4d   : > { %748 = vmatprep.subr.msk.bf16.mxu0 %vm974_vm1, %v746_v31 }
  0x54   : > { %751 = vmatpush3.bf16.xpose.msk.msra.mxu0 %vm974_vm1, %v746_v31 }
  0x5b   : > { %688 = vmatmul.mubr.msk.f32.vlgmr.msra.gmra.mrb[0].mxu0 %vm289_vm0, %v262_v32 }
  0x5c   : > { %690 = vmatprep.mubr.msk.f32.mxu0 %vm289_vm0, %v263_v33 }
  0x5f   : > { %691 = vmatmul.mubr.msk.f32.gmra.mrb[2].mxu0 %vm289_vm0, %v264_v34 }
  0x8e   : > { %v272_v37 = vpop.permute.xlu0 %271 }
  0x8f   : > { %v282_v38 = vpop.permute.xlu1 %281 }
  0x92   : > { %v277_v39 = vpop.permute.xlu0 %276 }
  0x93   : > { %v287_v45 = vpop.permute.xlu1 %286 }
  0x96   : > { %v448_v60 = vpop.permute.xlu0 %447 }
 0x12e   : > { %v689_v40 = vpop.f32.mrb[0].mxu0 }
 0x12f   : > { %v422_v41 = vadd.f32 %v689_v40, %v277_v39  ;;  %v416_v42 = vpop.f32.mrb[1].mxu0 }
 0x130   : > { %v417_v43 = vadd.f32 %v416_v42, %v272_v37 }
 0x131   : > { %v436_v44 = vmul.f32 0.01, %v422_v41 }
 0x132   : > { %v435_v46 = vmul.f32 0.01, %v417_v43  ;;  %v692_v47 = vpop.f32.mrb[2].mxu0 }
 0x133   : > { %v440_v48 = vmax.f32 %v422_v41, %v436_v44  ;;  %v432_v49 = vadd.f32 %v692_v47, %v287_v45  ;;  %v426_v50 = vpop.f32.mrb[3].mxu0 }
 0x134   : > { %v439_v51 = vmax.f32 %v417_v43, %v435_v46  ;;  %v427_v52 = vadd.f32 %v426_v50, %v282_v38 }
 0x135   : > { %v438_v53 = vmul.f32 0.01, %v432_v49 }
 0x136   : > { %v437_v54 = vmul.f32 0.01, %v427_v52  ;;  %v753_v55 = vpack.c.bf16 %v440_v48, %v439_v51 }
 0x137   : > { %v442_v56 = vmax.f32 %v432_v49, %v438_v53 }
 0x138   : > { %v441_v57 = vmax.f32 %v427_v52, %v437_v54  ;;  %754 = vmatpush3.bf16.msra.mxu1 %v753_v55 }
 0x139   : > { %755 = vmatprep.subr.bf16.mxu1 %v868_v35 }
 0x13a   : > { %v756_v58 = vpack.c.bf16 %v442_v56, %v441_v57 }
 0x13c   : > { %757 = vmatpush3.bf16.msra.mxu1 %v756_v58 }
 0x13f   : > { %702 = vmatmul.mubr.msk.f32.vlgmr.msra.gmra.mrb[0].mxu1 %vm450_vm3, %v443_v59 }
 0x212   : > { %v520_v61 = vpop.f32.mrb[0].mxu1 }
 0x213   : > { %v521_v62 = vadd.f32 %v520_v61, %v448_v60  ;;  %v703_v63 = vpop.f32.mrb[1].mxu1 }
 0x215   : > { %524 = vst [vmem:[%s230_s17] sm:$0xff] %v521_v62 }
 0x216   : > { %816 = shalt.err (!%p813_p3)
}
 0x217   : > { %s817_s10 = scalar_lea.hbm %s1049_s30, 128  ;;  %s821_s13 = scalar_lea.hbm %s1096_s5, 384 }
 0x218   : > { %p818_p4 = scmp.ne.s32.totalorder %s1049_s30, %s817_s10  ;;  %p822_p9 = scmp.lt.u32.totalorder %s1049_s30, %s1096_s5 }
 0x219   : > { %p823_p10 = scmp.lt.u32.totalorder %s821_s13, %s817_s10  ;;  %p825_p12 = scmp.lt.u32.totalorder %s817_s10, %s1049_s30 }
 0x21a   : > { %p819_p7 = pnand %p818_p4, %p940_p5 }
 0x21b   : > { %p824_p11 = por %p823_p10, %p822_p9 }
 0x21c   : > { %p820_p8 = pneg %p819_p7 }
 0x21d   : > { %p826_p13 = por %p825_p12, %p824_p11 }
 0x21f   : > { %p827_p0 = pnand %p826_p13, %p820_p8 }
 0x221   : > { %830 = shalt.err (!%p827_p0)
}
 0x222   : > { %758 = dma.vmem_to_hbm [thread:$0]  (%p940_p5), %s1051_s23, 128, %s1049_s30, %s526_s6  }
 0x223 PF: > { %p764_p1 = scmp.ge.s32.totalorder %s865_s21, 2  ;;  %s551_s16 = sand.u32 1, %s853_s18  }
 0x224   : > { %s552_s17 = scalar_lea.sflag [#allocation3], %s551_s16 }
 0x225   : > { %p761_p2 = pnand %p764_p1, %p944_p6 }
 0x227   : > { %848 = dma.done.wait (!%p761_p2), %s552_s17, 128  }
 0x228   : > { %850 = vsyncadd (!%p761_p2), %s552_s17, 4294967168  ;;  %p15_p3 = scmp.ge.s32.totalorder %s927_s24, 5   ;;  %s1101_s18 = smov %s857_s19 }
 0x229   : > { %s1102_s19 = smov %s861_s20  ;;  %s1103_s20 = smov %s938_s27 }
 0x22a   : > { %s1104_s21 = smov %s927_s24  ;;  %17 = sbr.rel (!%p15_p3) target bundleno = 3 (0x3), region = 75 }
 0x231   :  { %557 = vsyncpa [#allocation3], 1 }
 0x232   :  { %559 = vsyncpa [#allocation3 + $0x1], 1 }

</bundles_post_ra>
